<compile_context>
chip_gen: v7x
topology: tpu7x:2x2x1
jax: 0.10.0
libtpu: 0.0.40
codegen_flags: <defaults>
</compile_context>

<pallas_src>
import math

import numpy as np
import jax
import jax.numpy as jnp
from jax.experimental import pallas as pl
from jax.experimental.pallas import tpu as pltpu


_INV_SQRT2 = 1.0 / math.sqrt(2.0)


def _gelu_exact(h):
    # Exact (erf-based) GELU, bit-matching torch.nn.GELU() default semantics.
    return 0.5 * h * (1.0 + jax.lax.erf(h * _INV_SQRT2))


# --------------------------------------------------------------------------
# Kernels (pixel dim on lanes, channels on sublanes -> NCHW read/written
# directly, no layout transposes in the wrapper).
# --------------------------------------------------------------------------
def _mlp2d_kernel_resident(x_ref, w1_ref, b1_ref, w2_ref, b2_ref, o_ref):
    # x_ref : (Cin,  t_hw)   w1_ref: (Chid, Cin)   b1_ref: (Chid, 1)
    # w2_ref: (Cout, Chid)   b2_ref: (Cout, 1)     o_ref : (Cout, t_hw)
    h = jnp.dot(w1_ref[...], x_ref[...], preferred_element_type=jnp.float32)
    h = _gelu_exact(h + b1_ref[...].astype(jnp.float32))
    # Dropout(p=0.0) is the identity in train and eval -> no-op.
    y = jnp.dot(w2_ref[...], h.astype(w2_ref.dtype),
                preferred_element_type=jnp.float32)
    o_ref[...] = (y + b2_ref[...].astype(jnp.float32)).astype(o_ref.dtype)


def _mlp2d_kernel_ktiled(x_ref, w1_ref, b1_ref, w2_ref, b2_ref, o_ref, acc_ref):
    # Fallback for hidden sizes too large to keep resident in VMEM.
    # x_ref : (Cin,  t_hw)   w1_ref: (tk, Cin)   b1_ref: (tk, 1)
    # w2_ref: (Cout, tk)     b2_ref: (Cout, 1)   o_ref : (Cout, t_hw)
    k = pl.program_id(2)

    @pl.when(k == 0)
    def _():
        acc_ref[...] = jnp.zeros_like(acc_ref)

    h = jnp.dot(w1_ref[...], x_ref[...], preferred_element_type=jnp.float32)
    h = _gelu_exact(h + b1_ref[...].astype(jnp.float32))
    acc_ref[...] += jnp.dot(w2_ref[...], h.astype(w2_ref.dtype),
                            preferred_element_type=jnp.float32)

    @pl.when(k == pl.num_programs(2) - 1)
    def _():
        o_ref[...] = (acc_ref[...] + b2_ref[...].astype(jnp.float32)
                      ).astype(o_ref.dtype)


# --------------------------------------------------------------------------
# Planning helpers
# --------------------------------------------------------------------------
def _vmem_budget_bytes():
    """Per-chip scoped-VMEM budget: ~75% of physical, capped at 100 MiB.
    -> ~96 MiB on v5e/v6e (128 MiB VMEM), ~48 MiB on v7x (64 MiB VMEM)."""
    phys = 64 << 20  # conservative fallback (safe on every generation)
    try:
        info = pltpu.get_tpu_info()
        phys = int(getattr(info, "vmem_capacity_bytes", phys))
    except Exception:
        pass
    return int(min(phys * 3 // 4, 100 << 20))


def _choose_hw_tile(HW, want):
    """Return (t_hw, HW_pad). Prefer a multiple-of-128 exact divisor of HW;
    else use the full HW as a single block when it is small; else pad."""
    want = max(128, (want // 128) * 128)
    if HW % 128 == 0:
        t = min(want, HW)
        while HW % t != 0:
            t -= 128
        return t, HW
    if HW <= max(want, 1024):
        return HW, HW              # full-extent block: no (8,128) requirement
    HW_pad = pl.cdiv(HW, 128) * 128
    t = min(want, HW_pad)
    while HW_pad % t != 0:
        t -= 128
    return t, HW_pad


def _nbytes(*dims_and_itemsize):
    n = 1
    for d in dims_and_itemsize:
        n *= int(d)
    return n


# --------------------------------------------------------------------------
# Wrapper
# --------------------------------------------------------------------------
def mlp2d_pallas(x_nchw, w1, b1, w2, b2, *, hw_tile=512, k_tile=512):
    """Fused Mlp2d forward.

    x_nchw: (N, Cin, H, W).  Weights in PyTorch 1x1-conv layout (squeezed):
      w1: (Chid, Cin), b1: (Chid,), w2: (Cout, Chid), b2: (Cout,).
    Returns (N, Cout, H, W).
    """
    N, Cin, H, W = x_nchw.shape
    Chid, _ = w1.shape
    Cout = w2.shape[0]
    HW = H * W

    act_b = np.dtype(x_nchw.dtype).itemsize
    w_b = np.dtype(w1.dtype).itemsize
    budget = _vmem_budget_bytes()

    # ---- pixel tiling (lane axis) -----------------------------------------
    t_hw, HW_pad = _choose_hw_tile(HW, hw_tile)

    # ---- decide weight-resident vs hidden-tiled ---------------------------
    def resident_bytes(t):
        need = 2 * (Cin + Cout) * t * act_b          # double-buffered x / out
        need += 2 * Chid * (Cin + Cout) * w_b        # W1 + W2 (double-buffered)
        need += Chid * t * (4 + w_b)                 # f32 intermediate + cast
        need += 4 * (Chid + Cout)                    # biases
        return int(need * 1.25)                      # layout / pipelining slack

    resident = resident_bytes(t_hw) <= budget
    if not resident and t_hw % 128 == 0:
        t = t_hw - 128
        while t >= 128:
            if HW_pad % t == 0 and resident_bytes(t) <= budget:
                t_hw, resident = t, True
                break
            t -= 128

    # ---- megacore: make sure the parallel grid has >= 2 tiles when possible
    n_hw = HW_pad // t_hw
    if N * n_hw < 2 and t_hw % 256 == 0:
        t_hw //= 2
        n_hw = HW_pad // t_hw

    # ---- hidden tiling (only for the non-resident fallback) ---------------
    if resident:
        K_pad, tk = Chid, Chid
    else:
        tk = max(128, (min(k_tile, Chid) // 128) * 128)
        t = tk
        while t >= 128:                 # prefer an exact divisor (no padding)
            if Chid % t == 0:
                tk = t
                break
            t -= 128
        K_pad = pl.cdiv(Chid, tk) * tk
        if K_pad != Chid:
            # Zero-padded hidden units contribute gelu(0) @ 0 == 0: exact no-op.
            w1 = jnp.pad(w1, ((0, K_pad - Chid), (0, 0)))
            b1 = jnp.pad(b1, ((0, K_pad - Chid),))
            w2 = jnp.pad(w2, ((0, 0), (0, K_pad - Chid)))

    # ---- NCHW viewed as (N, Cin, H*W): zero-copy reshape, no transpose -----
    x3d = x_nchw.reshape(N, Cin, HW)
    if HW_pad != HW:
        x3d = jnp.pad(x3d, ((0, 0), (0, 0), (0, HW_pad - HW)))

    b1_2d = b1.reshape(K_pad, 1)
    b2_2d = b2.reshape(Cout, 1)

    # ---- specs / grid -------------------------------------------------------
    if resident:
        grid = (N, n_hw)
        in_specs = [
            pl.BlockSpec((None, Cin, t_hw), lambda n, j: (n, 0, j)),
            pl.BlockSpec((Chid, Cin), lambda n, j: (0, 0)),     # constant ->
            pl.BlockSpec((Chid, 1), lambda n, j: (0, 0)),       # fetched once,
            pl.BlockSpec((Cout, Chid), lambda n, j: (0, 0)),    # VMEM-resident
            pl.BlockSpec((Cout, 1), lambda n, j: (0, 0)),
        ]
        out_specs = pl.BlockSpec((None, Cout, t_hw), lambda n, j: (n, 0, j))
        scratch = []
        kernel = _mlp2d_kernel_resident
        dim_sem = ("parallel", "parallel")
        weight_reads = 1
    else:
        grid = (N, n_hw, K_pad // tk)
        in_specs = [
            pl.BlockSpec((None, Cin, t_hw), lambda n, j, k: (n, 0, j)),
            pl.BlockSpec((tk, Cin), lambda n, j, k: (k, 0)),
            pl.BlockSpec((tk, 1), lambda n, j, k: (k, 0)),
            pl.BlockSpec((Cout, tk), lambda n, j, k: (0, k)),
            pl.BlockSpec((Cout, 1), lambda n, j, k: (0, 0)),
        ]
        out_specs = pl.BlockSpec((None, Cout, t_hw), lambda n, j, k: (n, 0, j))
        scratch = [pltpu.VMEM((Cout, t_hw), jnp.float32)]
        kernel = _mlp2d_kernel_ktiled
        dim_sem = ("parallel", "parallel", "arbitrary")
        weight_reads = N * n_hw          # weights re-streamed per pixel tile

    M_eff = N * HW_pad
    cost = pl.CostEstimate(
        flops=int(2 * M_eff * (Cin * K_pad + K_pad * Cout)),
        transcendentals=int(M_eff * K_pad),
        bytes_accessed=int(
            _nbytes(N, Cin, HW_pad, act_b)                     # x read
            + _nbytes(N, Cout, HW_pad, act_b)                  # y written
            + weight_reads * _nbytes(K_pad, Cin + Cout, w_b)   # W1 + W2
            + _nbytes(K_pad + Cout, w_b)),                     # biases
    )

    out3d = pl.pallas_call(
        kernel,
        out_shape=jax.ShapeDtypeStruct((N, Cout, HW_pad), x_nchw.dtype),
        grid_spec=pltpu.PrefetchScalarGridSpec(
            num_scalar_prefetch=0,
            grid=grid,
            in_specs=in_specs,
            out_specs=out_specs,
            scratch_shapes=scratch,
        ),
        compiler_params=pltpu.CompilerParams(
            dimension_semantics=dim_sem,
            vmem_limit_bytes=int(budget),
        ),
        cost_estimate=cost,
    )(x3d, w1, b1_2d, w2, b2_2d)

    if HW_pad != HW:
        out3d = out3d[:, :, :HW]
    return out3d.reshape(N, Cout, H, W)


# --------------------------------------------------------------------------
# Reference + init (PyTorch 1x1-conv weight layout)
# --------------------------------------------------------------------------
def init_params(key, in_features, hidden_features, out_features, dtype=jnp.float32):
    """Deterministic init mimicking nn.Conv2d defaults; weights kept in the
    PyTorch layout: w1 (Chid, Cin), w2 (Cout, Chid)."""
    k1, k2, k3, k4 = jax.random.split(key, 4)
    bound1 = 1.0 / math.sqrt(in_features)       # fan_in of fc1 (1x1 kernel)
    bound2 = 1.0 / math.sqrt(hidden_features)   # fan_in of fc2
    w1 = jax.random.uniform(k1, (hidden_features, in_features), dtype, -bound1, bound1)
    b1 = jax.random.uniform(k2, (hidden_features,), dtype, -bound1, bound1)
    w2 = jax.random.uniform(k3, (out_features, hidden_features), dtype, -bound2, bound2)
    b2 = jax.random.uniform(k4, (out_features,), dtype, -bound2, bound2)
    return w1, b1, w2, b2


def mlp2d_ref(x_nchw, w1, b1, w2, b2):
    """Pure-JAX f32 reference of the same forward pass (NCHW in / NCHW out)."""
    hi = jax.lax.Precision.HIGHEST
    x = x_nchw.astype(jnp.float32)
    h = jnp.einsum("nchw,dc->ndhw", x, w1.astype(jnp.float32), precision=hi)
    h = h + b1.astype(jnp.float32)[None, :, None, None]
    h = 0.5 * h * (1.0 + jax.lax.erf(h * _INV_SQRT2))
    y = jnp.einsum("ndhw,ed->nehw", h, w2.astype(jnp.float32), precision=hi)
    y = y + b2.astype(jnp.float32)[None, :, None, None]
    return y.astype(x_nchw.dtype)


if __name__ == "__main__":
    key = jax.random.PRNGKey(0)
    kx, kp = jax.random.split(key)

    # Small shapes consistent with the module's forward: NCHW input.
    N, Cin, H, W = 2, 4, 16, 16
    hidden_features = 32
    out_features = Cin  # out_features defaults to in_features

    x = jax.random.normal(kx, (N, Cin, H, W), dtype=jnp.float32)
    w1, b1, w2, b2 = init_params(kp, Cin, hidden_features, out_features)

    out = mlp2d_pallas(x, w1, b1, w2, b2)
    out = jax.block_until_ready(out)

    ref = mlp2d_ref(x, w1, b1, w2, b2)
    assert out.shape == (N, out_features, H, W), out.shape
    max_err = float(jnp.max(jnp.abs(out.astype(jnp.float32) - ref.astype(jnp.float32))))
    assert max_err < 2e-5, f"max_err={max_err}"

    print("KERNEL_OK")
</pallas_src>

<mosaic_0001>
module attributes {stable_mosaic.version = 11 : i64} {
  func.func @_mlp2d_kernel_resident(%arg0: i32, %arg1: i32, %arg2: memref<1x4x256xf32, #tpu.memory_space<vmem>>, %arg3: memref<32x4xf32, #tpu.memory_space<vmem>>, %arg4: memref<32x1xf32, #tpu.memory_space<vmem>>, %arg5: memref<4x32xf32, #tpu.memory_space<vmem>>, %arg6: memref<4x1xf32, #tpu.memory_space<vmem>>, %arg7: memref<1x4x256xf32, #tpu.memory_space<vmem>>) attributes {dimension_semantics = [#tpu.dimension_semantics<parallel>, #tpu.dimension_semantics<parallel>], iteration_bounds = array<i64: 2, 1>, scalar_prefetch = 0 : i64, scratch_operands = 0 : i64, tpu.core_type = #tpu.core_type<tc>, window_params = [{transform_indices = @transform_0, window_bounds = array<i64: 1, 4, 256>}, {pipeline_mode = #tpu.pipeline_mode<synchronous>, transform_indices = @transform_1, window_bounds = array<i64: 32, 4>}, {pipeline_mode = #tpu.pipeline_mode<synchronous>, transform_indices = @transform_2, window_bounds = array<i64: 32, 1>}, {pipeline_mode = #tpu.pipeline_mode<synchronous>, transform_indices = @transform_3, window_bounds = array<i64: 4, 32>}, {pipeline_mode = #tpu.pipeline_mode<synchronous>, transform_indices = @transform_4, window_bounds = array<i64: 4, 1>}, {transform_indices = @transform_5, window_bounds = array<i64: 1, 4, 256>}]} {
    %c0 = arith.constant 0 : index
    %c0_0 = arith.constant 0 : index
    %0 = vector.load %arg3[%c0, %c0_0] : memref<32x4xf32, #tpu.memory_space<vmem>>, vector<32x4xf32>
    %c0_1 = arith.constant 0 : index
    %c0_2 = arith.constant 0 : index
    %c0_3 = arith.constant 0 : index
    %1 = vector.load %arg2[%c0_1, %c0_2, %c0_3] : memref<1x4x256xf32, #tpu.memory_space<vmem>>, vector<1x4x256xf32>
    %2 = vector.shape_cast %1 : vector<1x4x256xf32> to vector<4x256xf32>
    %cst = arith.constant dense<0.000000e+00> : vector<32x256xf32>
    %3 = tpu.matmul %0, %2, %cst {dimension_numbers = #tpu.dot_dimension_numbers<[1], [0], [0], [1], [0, 0, 1, 1], [], []>} : vector<32x4xf32>, vector<4x256xf32>, vector<32x256xf32> -> vector<32x256xf32>
    %c0_4 = arith.constant 0 : index
    %c0_5 = arith.constant 0 : index
    %4 = vector.load %arg4[%c0_4, %c0_5] : memref<32x1xf32, #tpu.memory_space<vmem>>, vector<32x1xf32>
    %5 = vector.broadcast %4 : vector<32x1xf32> to vector<32x256xf32>
    %6 = arith.addf %3, %5 : vector<32x256xf32>
    %cst_6 = arith.constant 5.000000e-01 : f32
    %7 = vector.broadcast %cst_6 : f32 to vector<32x256xf32>
    %8 = arith.mulf %7, %6 : vector<32x256xf32>
    %cst_7 = arith.constant 0.707106769 : f32
    %9 = vector.broadcast %cst_7 : f32 to vector<32x256xf32>
    %10 = arith.mulf %6, %9 : vector<32x256xf32>
    %11 = math.erf %10 : vector<32x256xf32>
    %cst_8 = arith.constant 1.000000e+00 : f32
    %12 = vector.broadcast %cst_8 : f32 to vector<32x256xf32>
    %13 = arith.addf %12, %11 : vector<32x256xf32>
    %14 = arith.mulf %8, %13 : vector<32x256xf32>
    %c0_9 = arith.constant 0 : index
    %c0_10 = arith.constant 0 : index
    %15 = vector.load %arg5[%c0_9, %c0_10] : memref<4x32xf32, #tpu.memory_space<vmem>>, vector<4x32xf32>
    %cst_11 = arith.constant dense<0.000000e+00> : vector<4x256xf32>
    %16 = tpu.matmul %15, %14, %cst_11 {dimension_numbers = #tpu.dot_dimension_numbers<[1], [0], [0], [1], [0, 0, 1, 1], [], []>} : vector<4x32xf32>, vector<32x256xf32>, vector<4x256xf32> -> vector<4x256xf32>
    %c0_12 = arith.constant 0 : index
    %c0_13 = arith.constant 0 : index
    %17 = vector.load %arg6[%c0_12, %c0_13] : memref<4x1xf32, #tpu.memory_space<vmem>>, vector<4x1xf32>
    %18 = vector.broadcast %17 : vector<4x1xf32> to vector<4x256xf32>
    %19 = arith.addf %16, %18 : vector<4x256xf32>
    %c0_14 = arith.constant 0 : index
    %c0_15 = arith.constant 0 : index
    %c0_16 = arith.constant 0 : index
    %20 = vector.load %arg7[%c0_14, %c0_15, %c0_16] : memref<1x4x256xf32, #tpu.memory_space<vmem>>, vector<1x4x256xf32>
    %21 = vector.shape_cast %20 : vector<1x4x256xf32> to vector<4x256xf32>
    %22 = vector.shape_cast %19 : vector<4x256xf32> to vector<1x4x256xf32>
    tpu.vector_store %arg7[%c0_14, %c0_15, %c0_16], %22 {strides = array<i32>} : memref<1x4x256xf32, #tpu.memory_space<vmem>>, vector<1x4x256xf32>,
    return
  }
  func.func @transform_0(%arg0: i32, %arg1: i32) -> (i32, i32, i32) {
    %c0_i32 = arith.constant 0 : i32
    %c0_i32_0 = arith.constant 0 : i32
    return %arg0, %c0_i32, %arg1 : i32, i32, i32
  }
  func.func @transform_1(%arg0: i32, %arg1: i32) -> (i32, i32) {
    %c0_i32 = arith.constant 0 : i32
    %c0_i32_0 = arith.constant 0 : i32
    %c0_i32_1 = arith.constant 0 : i32
    return %c0_i32, %c0_i32_0 : i32, i32
  }
  func.func @transform_2(%arg0: i32, %arg1: i32) -> (i32, i32) {
    %c0_i32 = arith.constant 0 : i32
    %c0_i32_0 = arith.constant 0 : i32
    %c0_i32_1 = arith.constant 0 : i32
    return %c0_i32, %c0_i32_0 : i32, i32
  }
  func.func @transform_3(%arg0: i32, %arg1: i32) -> (i32, i32) {
    %c0_i32 = arith.constant 0 : i32
    %c0_i32_0 = arith.constant 0 : i32
    %c0_i32_1 = arith.constant 0 : i32
    return %c0_i32, %c0_i32_0 : i32, i32
  }
  func.func @transform_4(%arg0: i32, %arg1: i32) -> (i32, i32) {
    %c0_i32 = arith.constant 0 : i32
    %c0_i32_0 = arith.constant 0 : i32
    %c0_i32_1 = arith.constant 0 : i32
    return %c0_i32, %c0_i32_0 : i32, i32
  }
  func.func @transform_5(%arg0: i32, %arg1: i32) -> (i32, i32, i32) {
    %c0_i32 = arith.constant 0 : i32
    %c0_i32_0 = arith.constant 0 : i32
    return %arg0, %c0_i32, %arg1 : i32, i32, i32
  }
}

</mosaic_0001>

<bundles_post_ra>
// kernel: tpu_custom_call.1
= control target key start
LH: loop header
LB: loop body
LE: loop exit
PB: predicated region body
PF: predicated region fallthrough
CT: control target
= control target key end

     0   :  { %10 = vsyncpa [#allocation3], 0  ;;  %s973_s0 = inlined_call_operand.vmem [shape: f32[2,4,256], index: 0, kind: input, shape index: {}]   ;;  %s974_s1 = inlined_call_operand.vmem [shape: f32[32,4], index: 1, kind: input, shape index: {}]   ;;  %s975_s2 = inlined_call_operand.vmem [shape: f32[32,1], index: 2, kind: input, shape index: {}]   ;;  %s976_s3 = inlined_call_operand.vmem [shape: f32[4,32], index: 3, kind: input, shape index: {}]   ;;  %s977_s4 = inlined_call_operand.vmem [shape: f32[4,1], index: 4, kind: input, shape index: {}]   ;;  %s978_s5 = inlined_call_operand.hbm [shape: f32[2,4,256], index: 5, kind: output, shape index: {}]  }
   0x1   :  { %12 = vsyncpa [#allocation3 + $0x1], 0  ;;  %s831_s18 = smov 0   ;;  %s833_s19 = smov 0  }
   0x2   :  { %s835_s20 = smov 0   ;;  %s837_s21 = smov 0  }
   0x3   :  { %s839_s22 = smov 0   ;;  %s841_s23 = smov 0  }
   0x4 LB: > { %s612_s24 = sadd.s32 4294967295, %s796_s23   ;;  %s613_s25 = sadd.s32 4294967294, %s796_s23   ;;  %s796_s23 = sphi %s841_s23, %s18_s23   ;;  %s792_s22 = sphi %s839_s22, %s985_s22   ;;  %s788_s21 = sphi %s837_s21, %s984_s21   ;;  %s784_s20 = sphi %s835_s20, %s983_s20   ;;  %s780_s19 = sphi %s833_s19, %s982_s19   ;;  %s776_s18 = sphi %s831_s18, %s981_s18  }
   0x5   : > { %s30_s26 = sadd.s32 1, %s792_s22  ;;  %s151_s27 = sadd.s32 1, %s784_s20 }
   0x6   : > { %p32_p0 = scmp.ge.s32.totalorder %s30_s26, 2  ;;  %p161_p1 = scmp.ne.s32.totalorder %s784_s20, %s780_s19 }
   0x7   : > { %p162_p2 = scmp.eq.s32.totalorder %s612_s24, 1  ;;  %p167_p3 = scmp.ne.s32.totalorder %s780_s19, %s776_s18 }
   0x8   : > { %s987_s26 = smov (%p32_p0, %s30_s26), 0  ;;  %p168_p5 = scmp.eq.s32.totalorder %s613_s25, 1 }
   0x9   : > { %p871_p4 = por %p162_p2, %p161_p1  ;;  %s146_s29 = ssub.s32 %s792_s22, %s987_s26 }
   0xa   : > { %p616_p6 = scmp.ge.s32.totalorder %s796_s23, 1  ;;  %p149_p7 = scmp.eq.s32.totalorder %s146_s29, 0 }
   0xb   : > { %p878_p8 = por %p168_p5, %p167_p3  ;;  %p211_p9 = scmp.lt.s32.totalorder %s796_s23, 3 }
   0xc   : > { %s884_s6 = scalar_select %p149_p7, %s784_s20, %s151_s27  }
   0xd   : > { %p212_p10 = pnand %p616_p6, %p211_p9 }
   0xe   : > { %p244_p11 = scmp.lt.s32.totalorder (!%p212_p10), %s788_s21, 1  ;;  %v798_v0 = vmov (!%p212_p10), 0.0   ;;  %v259_v1 = vld [vmem:[%s975_s2] sm:$0xff] (!%p212_p10)  ;;  %v799_v2 = vmov (!%p212_p10), 0   ;;  %v261_v3 = vld [vmem:[%s975_s2 + $0x10] sm:$0xff] (!%p212_p10)  ;;  %v260_v4 = vld [vmem:[%s975_s2 + $0x8] sm:$0xff] (!%p212_p10) }
   0xf   : > { %215 = sbr.rel (%p212_p10) target bundleno = 512 (0x200), region = 40  ;;  %367 = vmatprep.mubr.f32.mxu0 (!%p212_p10), %v798_v0  ;;  %507 = vmatprep.mubr.f32.mxu1 (!%p212_p10), %v798_v0  ;;  %v262_v5 = vld [vmem:[%s975_s2 + $0x18] sm:$0xff] (!%p212_p10)  ;;  %vm298_vm0 = vcmask (!%p212_p10), 1043456   ;;  %v254_v8 = vld [vmem:[%s974_s1] sm:$0xff] (!%p212_p10)  ;;  %vm285_vm1 = vcmask (!%p212_p10), 31744   ;;  %v255_v10 = vld [vmem:[%s974_s1 + $0x8] sm:$0xff] (!%p212_p10) }
  0x10   : > { %699 = vset.pattern.permute.xlu0 (!%p212_p10), %v799_v2  ;;  %700 = vset.pattern.permute.xlu1 (!%p212_p10), %v799_v2  ;;  %v433_v9 = vld [vmem:[%s977_s4] sm:$0xf] (!%p212_p10)  ;;  %v256_v11 = vld [vmem:[%s974_s1 + $0x10] sm:$0xff] (!%p212_p10)  ;;  %v257_v12 = vld [vmem:[%s974_s1 + $0x18] sm:$0xff] (!%p212_p10)  ;;  %vm439_vm2 = vcmask (!%p212_p10), 261120   ;;  %s240_s17 = sand.u32 (!%p212_p10), 1, %s780_s19  }
  0x11   : > { %265 = vperm.xlu0 (!%p212_p10), %699, %v259_v1   ;;  %275 = vperm.xlu1 (!%p212_p10), %700, %v261_v3   ;;  %s617_s24 = sshll.u32 (!%p212_p10), %s240_s17, 3  ;;  %s520_s10 = scalar_lea.sflag (!%p212_p10), [#allocation3], %s240_s17 }
  0x12   : > { %s242_s27 = scalar_lea.vmem (!%p212_p10), [#allocation2], %s617_s24 }
  0x13   : > { %s536_s29 = sshll.u32 (!%p212_p10), %s242_s27, 4  ;;  %s928_s29 = int_to_ptr.vmem [resolvable:$true] %s536_s29 }
  0x14   : > { %s718_s11 = scalar_lea.vmem (!%p212_p10), %s928_s29, 128 }
  0x15   : > { %270 = vperm.xlu0 (!%p212_p10), %699, %v260_v4   ;;  %280 = vperm.xlu1 (!%p212_p10), %700, %v262_v5   ;;  %p719_p12 = scmp.ne.s32.totalorder (!%p212_p10), %s928_s29, %s718_s11 }
  0x16   : > { %s245_s9 = scalar_select %p244_p11, %s788_s21, 1 }
  0x17   : > { %p720_p13 = pnand %p719_p12, %p871_p4 }
  0x18   : > { %s632_s12 = sshll.u32 %s245_s9, 3 }
  0x19   : > { %s251_s25 = scalar_lea.vmem %s973_s0, %s632_s12  ;;  %436 = vperm.xlu0 %699, %v433_v9   ;;  %p721_p0 = pneg %p720_p13 }
  0x1a   : > { %v258_v6 = vld [vmem:[%s251_s25] sm:$0xff]  ;;  %s633_s25 = sshll.u32 %s788_s21, 7  ;;  %s800_s21 = smov [#allocation2]  }
  0x1b   : > { %v284_v7 = vcombine.high %v258_v6, %v258_v6  ;;  %s926_s9 = scalar_lea.hbm %s978_s5, %s633_s25  ;;  %s722_s12 = sshll.u32 %s800_s21, 4  ;;  %s723_s12 = int_to_ptr.vmem [resolvable:$false] %s722_s12 }
  0x1c   : > { %s724_s13 = scalar_lea.vmem %s723_s12, 256  ;;  %p725_p1 = scmp.lt.s32.totalorder %s928_s29, %s723_s12 }
  0x1d   : > { %620 = vmatprep.subr.msk.mxu0 %vm298_vm0, %v284_v7  ;;  %p726_p2 = scmp.lt.s32.totalorder %s724_s13, %s718_s11 }
  0x1e   : > { %621 = vmatpush1.msk.msra.mxu0 %vm298_vm0, %v258_v6 }
  0x1f   : > { %622 = vmatmul.mubr.msk.f32.vlgmr.msra.gmra.mrb[0].mxu0 %vm285_vm1, %v254_v8  ;;  %p727_p3 = por %p726_p2, %p725_p1 }
  0x20   : > { %373 = vmatprep.mubr.f32.mxu0 %v798_v0 }
  0x21   : > { %p728_p5 = pnand %p727_p3, %p721_p0 }
  0x23   : > { %623 = vmatmul.mubr.msk.f32.gmra.mrb[2].mxu0 %vm285_vm1, %v255_v10 }
  0x24   : > { %379 = vmatprep.mubr.f32.mxu0 %v798_v0 }
  0x27   : > { %624 = vmatmul.mubr.msk.f32.gmra.mrb[4].mxu0 %vm285_vm1, %v256_v11 }
  0x28   : > { %385 = vmatprep.mubr.f32.mxu0 %v798_v0 }
  0x2b   : > { %625 = vmatmul.mubr.msk.f32.gmra.mrb[6].mxu0 %vm285_vm1, %v257_v12 }
  0x90   : > { %v266_v13 = vpop.permute.xlu0 %265  ;;  %v276_v24 = vpop.permute.xlu1 %275 }
  0x94   : > { %v271_v19 = vpop.permute.xlu0 %270  ;;  %v281_v33 = vpop.permute.xlu1 %280 }
  0xf2   : > { %v369_v14 = vpop.f32.mrb[0].mxu0 }
  0xf3   : > { %v370_v15 = vadd.f32 %v369_v14, %v266_v13  ;;  %v371_v16 = vpop.f32.mrb[1].mxu0  ;;  %v437_v14 = vpop.permute.xlu0 %436 }
  0xf4   : > { %v372_v17 = vadd.f32 %v371_v16, %v266_v13  ;;  %v432_v13 = vld [vmem:[%s976_s3] sm:$0xf] }
  0xf5   : > { %v400_v18 = vmul.f32 0.70710677, %v370_v15  ;;  %v392_v47 = vmul.f32 0.5, %v370_v15 }
  0xf6   : > { %v401_v20 = vmul.f32 0.70710677, %v372_v17  ;;  %v375_v21 = vpop.f32.mrb[2].mxu0  ;;  %v393_v50 = vmul.f32 0.5, %v372_v17 }
  0xf7   : > { %702 = verf.f32 %v400_v18  ;;  %v376_v22 = vadd.f32 %v375_v21, %v271_v19  ;;  %v377_v23 = vpop.f32.mrb[3].mxu0 }
  0xf8   : > { %704 = verf.f32 %v401_v20  ;;  %v378_v25 = vadd.f32 %v377_v23, %v271_v19 }
  0xf9   : > { %v402_v26 = vmul.f32 0.70710677, %v376_v22  ;;  %v394_v48 = vmul.f32 0.5, %v376_v22 }
  0xfa   : > { %v403_v27 = vmul.f32 0.70710677, %v378_v25  ;;  %v381_v28 = vpop.f32.mrb[4].mxu0  ;;  %v395_v51 = vmul.f32 0.5, %v378_v25 }
  0xfb   : > { %706 = verf.f32 %v402_v26  ;;  %v382_v29 = vadd.f32 %v381_v28, %v276_v24  ;;  %v383_v30 = vpop.f32.mrb[5].mxu0 }
  0xfc   : > { %708 = verf.f32 %v403_v27  ;;  %v384_v31 = vadd.f32 %v383_v30, %v276_v24 }
  0xfd   : > { %v404_v32 = vmul.f32 0.70710677, %v382_v29  ;;  %v396_v1 = vmul.f32 0.5, %v382_v29 }
  0xfe   : > { %v405_v34 = vmul.f32 0.70710677, %v384_v31  ;;  %v387_v35 = vpop.f32.mrb[6].mxu0  ;;  %v397_v4 = vmul.f32 0.5, %v384_v31 }
  0xff   : > { %710 = verf.f32 %v404_v32  ;;  %v388_v36 = vadd.f32 %v387_v35, %v281_v33  ;;  %v389_v37 = vpop.f32.mrb[7].mxu0 }
 0x100   : > { %712 = verf.f32 %v405_v34  ;;  %v390_v38 = vadd.f32 %v389_v37, %v281_v33 }
 0x101   : > { %v703_v39 = vpop.eup %702  ;;  %v406_v40 = vmul.f32 0.70710677, %v388_v36  ;;  %v398_v2 = vmul.f32 0.5, %v388_v36 }
 0x102   : > { %v705_v41 = vpop.eup %704  ;;  %v407_v42 = vmul.f32 0.70710677, %v390_v38  ;;  %v416_v43 = vadd.f32 1.0, %v703_v39  ;;  %v399_v5 = vmul.f32 0.5, %v390_v38 }
 0x103   : > { %714 = verf.f32 %v406_v40  ;;  %v417_v45 = vadd.f32 1.0, %v705_v41 }
 0x104   : > { %716 = verf.f32 %v407_v42  ;;  %v424_v53 = vmul.f32 %v416_v43, %v392_v47 }
 0x105   : > { %v707_v44 = vpop.eup %706  ;;  %v425_v56 = vmul.f32 %v417_v45, %v393_v50 }
 0x106   : > { %v709_v46 = vpop.eup %708  ;;  %v418_v49 = vadd.f32 1.0, %v707_v44 }
 0x107   : > { %v419_v52 = vadd.f32 1.0, %v709_v46 }
 0x108   : > { %v426_v54 = vmul.f32 %v418_v49, %v394_v48 }
 0x109   : > { %v711_v55 = vpop.eup %710  ;;  %v427_v57 = vmul.f32 %v419_v52, %v395_v51 }
 0x10a   : > { %v713_v58 = vpop.eup %712  ;;  %v636_v59 = vpack.c.bf16 %v426_v54, %v424_v53  ;;  %v420_v61 = vadd.f32 1.0, %v711_v55 }
 0x10b   : > { %v634_v60 = vpack.c.bf16 %v427_v57, %v425_v56  ;;  %v421_v63 = vadd.f32 1.0, %v713_v58 }
 0x10c   : > { %v428_v7 = vmul.f32 %v420_v61, %v396_v1 }
 0x10d   : > { %v715_v62 = vpop.eup %714  ;;  %635 = vmatprep.subr.bf16.mxu1 %v634_v60  ;;  %v429_v9 = vmul.f32 %v421_v63, %v397_v4 }
 0x10e   : > { %v717_v0 = vpop.eup %716  ;;  %v422_v3 = vadd.f32 1.0, %v715_v62  ;;  %637 = vmatpush1.bf16.msra.mxu1 %v636_v59 }
 0x10f   : > { %v423_v6 = vadd.f32 1.0, %v717_v0 }
 0x110   : > { %v430_v8 = vmul.f32 %v422_v3, %v398_v2 }
 0x111   : > { %v431_v10 = vmul.f32 %v423_v6, %v399_v5 }
 0x112   : > { %v640_v11 = vpack.c.bf16 %v430_v8, %v428_v7 }
 0x113   : > { %v638_v12 = vpack.c.bf16 %v431_v10, %v429_v9 }
 0x115   : > { %639 = vmatprep.subr.bf16.mxu1 %v638_v12 }
 0x116   : > { %641 = vmatpush1.bf16.msra.mxu1 %v640_v11 }
 0x119   : > { %626 = vmatmul.mubr.msk.f32.vlgmr.msra.gmra.mrb[0].mxu1 %vm439_vm2, %v432_v13 }
 0x1ec   : > { %v509_v15 = vpop.f32.mrb[0].mxu1 }
 0x1ed   : > { %v510_v16 = vadd.f32 %v509_v15, %v437_v14  ;;  %v511_v17 = vpop.f32.mrb[1].mxu1 }
 0x1ee   : > { %v512_v18 = vadd.f32 %v511_v17, %v437_v14 }
 0x1f0   : > { %v516_v19 = vcombine.low %v510_v16, %v512_v18 }
 0x1f2   : > { %518 = vst [vmem:[%s242_s27] sm:$0xff] %v516_v19 }
 0x1f3   : > { %731 = shalt.err (!%p728_p5)
}
 0x1f4   : > { %s732_s14 = scalar_lea.hbm %s926_s9, 128  ;;  %s736_s17 = scalar_lea.hbm %s978_s5, 256 }
 0x1f5   : > { %p733_p6 = scmp.ne.s32.totalorder %s926_s9, %s732_s14  ;;  %p737_p10 = scmp.lt.u32.totalorder %s926_s9, %s978_s5 }
 0x1f6   : > { %p738_p11 = scmp.lt.u32.totalorder %s736_s17, %s732_s14  ;;  %p740_p13 = scmp.lt.u32.totalorder %s732_s14, %s926_s9 }
 0x1f7   : > { %p734_p7 = pnand %p733_p6, %p871_p4 }
 0x1f8   : > { %p739_p12 = por %p738_p11, %p737_p10 }
 0x1f9   : > { %p735_p9 = pneg %p734_p7 }
 0x1fa   : > { %p741_p0 = por %p740_p13, %p739_p12 }
 0x1fc   : > { %p742_p1 = pnand %p741_p0, %p735_p9 }
 0x1fe   : > { %745 = shalt.err (!%p742_p1)
}
 0x1ff   : > { %642 = dma.vmem_to_hbm [thread:$0]  (%p871_p4), %s928_s29, 128, %s926_s9, %s520_s10  }
 0x200 PF: > { %p648_p2 = scmp.ge.s32.totalorder %s796_s23, 2  ;;  %s548_s27 = sand.u32 1, %s776_s18  }
 0x201   : > { %s549_s7 = scalar_lea.sflag [#allocation3], %s548_s27 }
 0x202   : > { %p645_p3 = pnand %p648_p2, %p878_p8 }
 0x204   : > { %771 = dma.done.wait (!%p645_p3), %s549_s7, 128  }
 0x205   : > { %773 = vsyncadd (!%p645_p3), %s549_s7, 4294967168  ;;  %s18_s23 = sadd.s32 1, %s796_s23   ;;  %s981_s18 = smov %s780_s19 }
 0x206   : > { %p15_p5 = scmp.ge.s32.totalorder %s18_s23, 4   ;;  %s982_s19 = smov %s784_s20 }
 0x207   : > { %s983_s20 = smov %s884_s6  ;;  %s984_s21 = smov %s792_s22 }
 0x208   : > { %s985_s22 = smov %s987_s26  ;;  %17 = sbr.rel (!%p15_p5) target bundleno = 4 (0x4), region = 75 }
 0x20f   :  { %554 = vsyncpa [#allocation3], 1 }
 0x210   :  { %556 = vsyncpa [#allocation3 + $0x1], 1 }

</bundles_post_ra>
